<compile_context>
chip_gen: v6e
topology: v6e:2x2x1
jax: 0.10.0
libtpu: 0.0.40
codegen_flags: <defaults>
</compile_context>

<pallas_src>
import jax
import jax.numpy as jnp
from jax import lax
from jax.experimental import pallas as pl
from jax.experimental.pallas import tpu as pltpu


def _round_up(x, m):
    return (x + m - 1) // m * m


def torchmodel_kernel(ids_ref, ewt_ref, b1_ref, w2_ref, b2_ref, out_ref):
    """One batch tile, transposed orientation (features on sublanes, batch on lanes).

    ids_ref : (1, 1, S*TB) int32  token ids, s-major flattened (r = s*TB + b)
    ewt_ref : (D, Vp)      f32    folded table (emb @ W1)^T, vocab padded to Vp
    b1_ref  : (D, 1)       f32    Linear(D,D) bias as a column
    w2_ref  : (D, 1)       f32    classify weight as a column
    b2_ref  : (1, 1)       f32    classify bias
    out_ref : (1, 1, TB)   f32    lane-dense per-tile output row
    """
    tb = out_ref.shape[-1]
    n_flat = ids_ref.shape[-1]
    s_len = n_flat // tb
    vp = ewt_ref.shape[1]

    # --- one-hot gather of the folded (emb @ W1) rows: a single MXU matmul --
    ids_row = ids_ref[0]                                      # (1, S*TB) int32
    v_iota = lax.broadcasted_iota(jnp.int32, (vp, n_flat), 0)
    onehot_t = (v_iota == ids_row).astype(jnp.float32)        # (Vp, S*TB)
    h_t = jnp.dot(ewt_ref[...], onehot_t,
                  preferred_element_type=jnp.float32)         # (D, S*TB)

    # --- bias + sigmoid (Dropout(0.1) is identity in eval mode) -------------
    # TODO(synk): training-mode dropout is not implemented.
    h_t = jax.nn.sigmoid(h_t + b1_ref[...])

    # --- AvgPool1d over the sentence: position s is the lane slab
    #     h_t[:, s*TB:(s+1)*TB]; sum the S slabs and scale ------------------
    pooled_t = h_t[:, 0:tb]
    for s in range(1, s_len):
        pooled_t = pooled_t + h_t[:, s * tb:(s + 1) * tb]
    pooled_t = pooled_t * (1.0 / s_len)                        # (D, TB)

    # --- Linear(D,1) + sigmoid: sublane reduce -> lane-dense (1, TB) --------
    logits = jnp.sum(pooled_t * w2_ref[...], axis=0, keepdims=True) + b2_ref[...]
    out_ref[0] = jax.nn.sigmoid(logits)


def torchmodel_forward(token_ids, emb_table, w1, b1, w2, b2, *, batch_tile=None):
    """Eval-mode forward of TorchModel.

    token_ids: (B, S) int32
    emb_table: (V, D) f32   (V = len(vocab) + 1)
    w1: (D, D) f32 in x @ W layout (torch nn.Linear weight transposed); b1: (D,)
    w2: (D,)  f32 classify weight;                                      b2: scalar
    Returns y_pred: (B, 1) f32.
    """
    B, S = token_ids.shape
    V, D = emb_table.shape

    # ---- tile selection: multiple of 8, fat tiles, >=2 tiles when possible --
    if batch_tile is None:
        bp8 = _round_up(B, 8)
        if bp8 >= 1024:
            batch_tile = 512
        elif bp8 >= 16:
            batch_tile = _round_up(bp8 // 2, 8)   # 2 grid steps -> v7x megacore
        else:
            batch_tile = bp8
    batch_tile = max(8, _round_up(batch_tile, 8))
    Bp = _round_up(B, batch_tile)
    num_tiles = Bp // batch_tile
    n_flat = S * batch_tile

    # ---- host-side algebraic fold: Linear(D,D) into the embedding table ----
    Vp = _round_up(V, 8)
    ew = jnp.dot(emb_table.astype(jnp.float32), w1.astype(jnp.float32),
                 precision=lax.Precision.HIGHEST)              # (V, D)
    ewt = jnp.zeros((D, Vp), jnp.float32).at[:, :V].set(ew.T)  # (D, Vp)
    b1_col = jnp.asarray(b1, jnp.float32).reshape(D, 1)
    w2_col = jnp.asarray(w2, jnp.float32).reshape(D, 1)
    b2_11 = jnp.asarray(b2, jnp.float32).reshape(1, 1)

    # ---- token ids: pad batch (token 0), s-major flatten per tile -----------
    ids = token_ids.astype(jnp.int32)
    ids_p = jnp.zeros((Bp, S), jnp.int32).at[:B, :].set(ids)
    ids_k = (ids_p.reshape(num_tiles, batch_tile, S)
                  .transpose(0, 2, 1)                          # (nt, S, TB)
                  .reshape(num_tiles, 1, n_flat))              # r = s*TB + b

    const = lambda i: (0, 0)

    # ---- tight VMEM budget (no arbitrary 48 MiB reservation) ----------------
    resident = 4 * (D * Vp + 2 * D + 1)
    per_step_io = 4 * (n_flat + batch_tile)
    intermediates = 4 * (n_flat * (Vp + D) + batch_tile * (D + 2))
    vmem_limit = int(min(32 * 1024 * 1024,
                         max(4 * 1024 * 1024,
                             resident + 2 * per_step_io + 2 * intermediates
                             + (1 << 20))))

    cost = pl.CostEstimate(
        flops=2 * Bp * S * Vp * D + 2 * Bp * D,
        transcendentals=Bp * S * D + Bp,
        bytes_accessed=4 * (Bp * S + D * Vp + 3 * D + 1 + Bp),
    )

    out = pl.pallas_call(
        torchmodel_kernel,
        out_shape=jax.ShapeDtypeStruct((num_tiles, 1, batch_tile), jnp.float32),
        grid=(num_tiles,),
        in_specs=[
            pl.BlockSpec((1, 1, n_flat), lambda i: (i, 0, 0)),   # token ids
            pl.BlockSpec((D, Vp), const),                        # folded table
            pl.BlockSpec((D, 1), const),                         # b1
            pl.BlockSpec((D, 1), const),                         # w2
            pl.BlockSpec((1, 1), const),                         # b2
        ],
        out_specs=pl.BlockSpec((1, 1, batch_tile), lambda i: (i, 0, 0)),
        compiler_params=pltpu.CompilerParams(
            dimension_semantics=("parallel",),
            vmem_limit_bytes=vmem_limit,
        ),
        cost_estimate=cost,
    )(ids_k, ewt, b1_col, w2_col, b2_11)

    return out.reshape(Bp)[:B].reshape(B, 1)


def _reference_forward(token_ids, emb_table, w1, b1, w2, b2):
    """Pure-JAX eval-mode forward of TorchModel (y=None branch)."""
    emb_x = jnp.take(emb_table, token_ids, axis=0)                           # (B,S,D)
    h = jax.nn.sigmoid(
        jnp.einsum("bsd,de->bse", emb_x, w1,
                   precision=lax.Precision.HIGHEST) + b1[None, None, :])
    pooled = jnp.mean(h, axis=1)                                             # (B,D)
    return jax.nn.sigmoid(
        jnp.sum(pooled * w2[None, :], axis=-1, keepdims=True) + b2)          # (B,1)


if __name__ == "__main__":
    sentence_length = 6     # S
    input_dim = 32          # D
    vocab_size = 20         # len(vocab); embedding table has vocab_size + 1 rows

    key = jax.random.PRNGKey(0)
    k_emb, k_w1, k_b1, k_w2, k_b2, k_x1, k_x2 = jax.random.split(key, 7)

    # nn.Embedding(len(vocab)+1, input_dim)
    emb_table = jax.random.normal(k_emb, (vocab_size + 1, input_dim), jnp.float32)
    # nn.Linear(input_dim, input_dim), stored pre-transposed for x @ W
    w1 = jax.random.normal(k_w1, (input_dim, input_dim), jnp.float32) * 0.1
    b1 = jax.random.normal(k_b1, (input_dim,), jnp.float32) * 0.1
    # nn.Linear(input_dim, 1) stored as a (D,) vector
    w2 = jax.random.normal(k_w2, (input_dim,), jnp.float32) * 0.1
    b2 = jax.random.normal(k_b2, (), jnp.float32) * 0.1

    # Case 1: the module's nominal tiny batch (B=2).
    x1 = jax.random.randint(k_x1, (2, sentence_length), 0, vocab_size + 1, jnp.int32)
    y1 = torchmodel_forward(x1, emb_table, w1, b1, w2, b2)
    jax.block_until_ready(y1)
    assert y1.shape == (2, 1)
    y1_ref = _reference_forward(x1, emb_table, w1, b1, w2, b2)
    assert jnp.allclose(y1, y1_ref, atol=1e-3, rtol=1e-3), (y1, y1_ref)

    # Case 2: exercises batch padding + a 2-step "parallel" grid (B=20).
    x2 = jax.random.randint(k_x2, (20, sentence_length), 0, vocab_size + 1, jnp.int32)
    y2 = torchmodel_forward(x2, emb_table, w1, b1, w2, b2)
    jax.block_until_ready(y2)
    assert y2.shape == (20, 1)
    y2_ref = _reference_forward(x2, emb_table, w1, b1, w2, b2)
    assert jnp.allclose(y2, y2_ref, atol=1e-3, rtol=1e-3), (y2, y2_ref)

    print("KERNEL_OK")
</pallas_src>

<mosaic_0001>
module attributes {stable_mosaic.version = 11 : i64} {
  func.func @torchmodel_kernel(%arg0: i32, %arg1: memref<1x1x48xi32, #tpu.memory_space<vmem>>, %arg2: memref<32x24xf32, #tpu.memory_space<vmem>>, %arg3: memref<32x1xf32, #tpu.memory_space<vmem>>, %arg4: memref<32x1xf32, #tpu.memory_space<vmem>>, %arg5: memref<1x1xf32, #tpu.memory_space<vmem>>, %arg6: memref<1x1x8xf32, #tpu.memory_space<vmem>>) attributes {dimension_semantics = [#tpu.dimension_semantics<parallel>], iteration_bounds = array<i64: 1>, scalar_prefetch = 0 : i64, scratch_operands = 0 : i64, tpu.core_type = #tpu.core_type<tc>, window_params = [{transform_indices = @transform_0, window_bounds = array<i64: 1, 1, 48>}, {pipeline_mode = #tpu.pipeline_mode<synchronous>, transform_indices = @transform_1, window_bounds = array<i64: 32, 24>}, {pipeline_mode = #tpu.pipeline_mode<synchronous>, transform_indices = @transform_2, window_bounds = array<i64: 32, 1>}, {pipeline_mode = #tpu.pipeline_mode<synchronous>, transform_indices = @transform_3, window_bounds = array<i64: 32, 1>}, {pipeline_mode = #tpu.pipeline_mode<synchronous>, transform_indices = @transform_4, window_bounds = array<i64: 1, 1>}, {transform_indices = @transform_5, window_bounds = array<i64: 1, 1, 8>}]} {
    %c0 = arith.constant 0 : index
    %c0_0 = arith.constant 0 : index
    %c0_1 = arith.constant 0 : index
    %0 = vector.load %arg1[%c0, %c0_0, %c0_1] : memref<1x1x48xi32, #tpu.memory_space<vmem>>, vector<1x1x48xi32>
    %1 = vector.shape_cast %0 : vector<1x1x48xi32> to vector<1x48xi32>
    %2 = tpu.iota {dimensions = array<i32: 0>} : vector<24x48xi32>
    %3 = vector.broadcast %1 : vector<1x48xi32> to vector<24x48xi32>
    %4 = arith.cmpi eq, %2, %3 : vector<24x48xi32>
    %5 = arith.extui %4 : vector<24x48xi1> to vector<24x48xi32>
    %6 = arith.sitofp %5 : vector<24x48xi32> to vector<24x48xf32>
    %c0_2 = arith.constant 0 : index
    %c0_3 = arith.constant 0 : index
    %7 = vector.load %arg2[%c0_2, %c0_3] : memref<32x24xf32, #tpu.memory_space<vmem>>, vector<32x24xf32>
    %cst = arith.constant dense<0.000000e+00> : vector<32x48xf32>
    %8 = tpu.matmul %7, %6, %cst {dimension_numbers = #tpu.dot_dimension_numbers<[1], [0], [0], [1], [0, 0, 1, 1], [], []>} : vector<32x24xf32>, vector<24x48xf32>, vector<32x48xf32> -> vector<32x48xf32>
    %c0_4 = arith.constant 0 : index
    %c0_5 = arith.constant 0 : index
    %9 = vector.load %arg3[%c0_4, %c0_5] : memref<32x1xf32, #tpu.memory_space<vmem>>, vector<32x1xf32>
    %10 = vector.broadcast %9 : vector<32x1xf32> to vector<32x48xf32>
    %11 = arith.addf %8, %10 : vector<32x48xf32>
    %12 = arith.negf %11 : vector<32x48xf32>
    %13 = math.exp %12 : vector<32x48xf32>
    %cst_6 = arith.constant 1.000000e+00 : f32
    %14 = vector.broadcast %cst_6 : f32 to vector<32x48xf32>
    %15 = arith.addf %14, %13 : vector<32x48xf32>
    %16 = arith.divf %14, %15 : vector<32x48xf32>
    %17 = vector.extract_strided_slice %16 {offsets = [0, 0], sizes = [32, 8], strides = [1, 1]} : vector<32x48xf32> to vector<32x8xf32>
    %18 = vector.extract_strided_slice %16 {offsets = [0, 8], sizes = [32, 8], strides = [1, 1]} : vector<32x48xf32> to vector<32x8xf32>
    %19 = arith.addf %17, %18 : vector<32x8xf32>
    %20 = vector.extract_strided_slice %16 {offsets = [0, 16], sizes = [32, 8], strides = [1, 1]} : vector<32x48xf32> to vector<32x8xf32>
    %21 = arith.addf %19, %20 : vector<32x8xf32>
    %22 = vector.extract_strided_slice %16 {offsets = [0, 24], sizes = [32, 8], strides = [1, 1]} : vector<32x48xf32> to vector<32x8xf32>
    %23 = arith.addf %21, %22 : vector<32x8xf32>
    %24 = vector.extract_strided_slice %16 {offsets = [0, 32], sizes = [32, 8], strides = [1, 1]} : vector<32x48xf32> to vector<32x8xf32>
    %25 = arith.addf %23, %24 : vector<32x8xf32>
    %26 = vector.extract_strided_slice %16 {offsets = [0, 40], sizes = [32, 8], strides = [1, 1]} : vector<32x48xf32> to vector<32x8xf32>
    %27 = arith.addf %25, %26 : vector<32x8xf32>
    %cst_7 = arith.constant 0.166666672 : f32
    %28 = vector.broadcast %cst_7 : f32 to vector<32x8xf32>
    %29 = arith.mulf %27, %28 : vector<32x8xf32>
    %c0_8 = arith.constant 0 : index
    %c0_9 = arith.constant 0 : index
    %30 = vector.load %arg4[%c0_8, %c0_9] : memref<32x1xf32, #tpu.memory_space<vmem>>, vector<32x1xf32>
    %31 = vector.broadcast %30 : vector<32x1xf32> to vector<32x8xf32>
    %32 = arith.mulf %29, %31 : vector<32x8xf32>
    %cst_10 = arith.constant dense<0.000000e+00> : vector<8xf32>
    %33 = vector.multi_reduction <add>, %32, %cst_10 [0] : vector<32x8xf32> to vector<8xf32>
    %34 = vector.shape_cast %33 : vector<8xf32> to vector<1x8xf32>
    %c0_11 = arith.constant 0 : index
    %c0_12 = arith.constant 0 : index
    %35 = vector.load %arg5[%c0_11, %c0_12] : memref<1x1xf32, #tpu.memory_space<vmem>>, vector<1x1xf32>
    %36 = vector.broadcast %35 : vector<1x1xf32> to vector<1x8xf32>
    %37 = arith.addf %34, %36 : vector<1x8xf32>
    %38 = arith.negf %37 : vector<1x8xf32>
    %39 = math.exp %38 : vector<1x8xf32>
    %cst_13 = arith.constant 1.000000e+00 : f32
    %40 = vector.broadcast %cst_13 : f32 to vector<1x8xf32>
    %41 = arith.addf %40, %39 : vector<1x8xf32>
    %42 = arith.divf %40, %41 : vector<1x8xf32>
    %c0_14 = arith.constant 0 : index
    %c0_15 = arith.constant 0 : index
    %c0_16 = arith.constant 0 : index
    %43 = vector.load %arg6[%c0_14, %c0_15, %c0_16] : memref<1x1x8xf32, #tpu.memory_space<vmem>>, vector<1x1x8xf32>
    %44 = vector.shape_cast %43 : vector<1x1x8xf32> to vector<1x8xf32>
    %45 = vector.shape_cast %42 : vector<1x8xf32> to vector<1x1x8xf32>
    tpu.vector_store %arg6[%c0_14, %c0_15, %c0_16], %45 {strides = array<i32>} : memref<1x1x8xf32, #tpu.memory_space<vmem>>, vector<1x1x8xf32>,
    return
  }
  func.func @transform_0(%arg0: i32) -> (i32, i32, i32) {
    %c0_i32 = arith.constant 0 : i32
    %c0_i32_0 = arith.constant 0 : i32
    %c0_i32_1 = arith.constant 0 : i32
    return %arg0, %c0_i32, %c0_i32_0 : i32, i32, i32
  }
  func.func @transform_1(%arg0: i32) -> (i32, i32) {
    %c0_i32 = arith.constant 0 : i32
    %c0_i32_0 = arith.constant 0 : i32
    %c0_i32_1 = arith.constant 0 : i32
    return %c0_i32, %c0_i32_0 : i32, i32
  }
  func.func @transform_2(%arg0: i32) -> (i32, i32) {
    %c0_i32 = arith.constant 0 : i32
    %c0_i32_0 = arith.constant 0 : i32
    %c0_i32_1 = arith.constant 0 : i32
    return %c0_i32, %c0_i32_0 : i32, i32
  }
  func.func @transform_3(%arg0: i32) -> (i32, i32) {
    %c0_i32 = arith.constant 0 : i32
    %c0_i32_0 = arith.constant 0 : i32
    %c0_i32_1 = arith.constant 0 : i32
    return %c0_i32, %c0_i32_0 : i32, i32
  }
  func.func @transform_4(%arg0: i32) -> (i32, i32) {
    %c0_i32 = arith.constant 0 : i32
    %c0_i32_0 = arith.constant 0 : i32
    %c0_i32_1 = arith.constant 0 : i32
    return %c0_i32, %c0_i32_0 : i32, i32
  }
  func.func @transform_5(%arg0: i32) -> (i32, i32, i32) {
    %c0_i32 = arith.constant 0 : i32
    %c0_i32_0 = arith.constant 0 : i32
    %c0_i32_1 = arith.constant 0 : i32
    return %arg0, %c0_i32, %c0_i32_0 : i32, i32, i32
  }
}

</mosaic_0001>

<bundles_post_ra>
// kernel: tpu_custom_call.1
= control target key start
LH: loop header
LB: loop body
LE: loop exit
PB: predicated region body
PF: predicated region fallthrough
CT: control target
= control target key end

     0   :  { %s548_s0 = inlined_call_operand.vmem [shape: s32[1,1,48], index: 0, kind: input, shape index: {}]   ;;  %s549_s1 = inlined_call_operand.vmem [shape: f32[32,24], index: 1, kind: input, shape index: {}]   ;;  %s550_s2 = inlined_call_operand.vmem [shape: f32[32,1], index: 2, kind: input, shape index: {}]   ;;  %s551_s3 = inlined_call_operand.vmem [shape: f32[32,1], index: 3, kind: input, shape index: {}]   ;;  %s552_s4 = inlined_call_operand.<no memory space> [shape: f32[1,1], index: 4, kind: input, shape index: {}]   ;;  %s553_s5 = inlined_call_operand.hbm [shape: f32[1,1,8], index: 5, kind: output, shape index: {}]  }
   0x1   :  { %v10_v0 = vstv %s552_s4 }
   0x2   :  { %11 = vst [vmem:[#allocation2] sm:$0x1] %v10_v0 }
   0x3   :  { %v24_v1 = vlaneseq  ;;  %v41_v2 = vld [vmem:[%s549_s1] sm:$0xff]  ;;  %vm69_vm0 = vcmask 195584   ;;  %v43_v3 = vld [vmem:[%s549_s1 + $0x10] sm:$0xff]  ;;  %v447_v6 = vmov 0  }
   0x4   :  { %383 = vmatprep.mubr.msk.f32.mxu0 %vm69_vm0, %v41_v2  ;;  %v45_v4 = vld [vmem:[%s550_s2] sm:$0xff]  ;;  %386 = vmatprep.mubr.msk.f32.mxu1 %vm69_vm0, %v43_v3  ;;  %v47_v7 = vld [vmem:[%s550_s2 + $0x10] sm:$0xff] }
   0x5   :  { %v498_v5 = vshrl.u32 %v24_v1, 7  ;;  %403 = vset.pattern.permute.xlu0 %v447_v6  ;;  %v354_v8 = vld [vmem:[%s548_s0] ss:$0 sm:$0xff]  ;;  %404 = vset.pattern.permute.xlu1 %v447_v6 }
   0x6   :  { %51 = vperm.xlu0 %403, %v45_v4   ;;  %61 = vperm.xlu1 %404, %v47_v7  }
   0x7   :  { %v27_v9 = vadd.s32 16, %v498_v5  ;;  %v26_v10 = vadd.s32 8, %v498_v5 }
   0x8   :  { %12 = vsyncpa [#allocation4], 0  ;;  %v448_v11 = vmov 1.0   ;;  %vm32_vm3 = vcmp.eq.s32.totalorder %v498_v5, %v354_v8  ;;  %v42_v12 = vld [vmem:[%s549_s1 + $0x8] sm:$0xff]  ;;  %v44_v13 = vld [vmem:[%s549_s1 + $0x18] sm:$0xff]  ;;  %s449_s15 = smov 112  }
   0x9   :  { %vm34_vm1 = vcmp.eq.s32.totalorder %v27_v9, %v354_v8  ;;  %vm33_vm2 = vcmp.eq.s32.totalorder %v26_v10, %v354_v8  ;;  %v46_v14 = vld [vmem:[%s550_s2 + $0x8] sm:$0xff]  ;;  %v48_v15 = vld [vmem:[%s550_s2 + $0x18] sm:$0xff]  ;;  %v279_v17 = vld [vmem:[%s551_s3] sm:$0xff]  ;;  %s450_s16 = smov 120   ;;  %s451_s17 = smov 104   ;;  %vm307_vm4 = vcmask 64512  }
   0xa   :  { %377 = vmatprep.subr.msk.mxu0 %vm34_vm1, %v448_v11  ;;  %389 = vmatprep.subr.msk.mxu1 %vm34_vm1, %v448_v11  ;;  %v280_v16 = vld [vmem:[%s551_s3 + $0x8] sm:$0xff]  ;;  %v281_v18 = vld [vmem:[%s551_s3 + $0x10] sm:$0xff]  ;;  %s452_s18 = smov 96   ;;  %s453_s19 = smov 88   ;;  %v282_v47 = vld [vmem:[%s551_s3 + $0x18] sm:$0xff]  ;;  %vm338_vm5 = vcmask 57344  }
   0xb   :  { %378 = vmatpush3.msk.msra.mxu0 %vm34_vm1, %v448_v11  ;;  %392 = vmatpush3.msk.msra.mxu1 %vm34_vm1, %v448_v11  ;;  %v321_v48 = vld [vmem:[#allocation2] sm:$0x1]  ;;  %s454_s3 = smov [#allocation3]  }
   0xc   :  { %379 = vmatprep.subr.msk.mxu0 %vm33_vm2, %v448_v11  ;;  %390 = vmatprep.subr.msk.mxu1 %vm33_vm2, %v448_v11  ;;  %s346_s22 = sshll.u32 %s454_s3, 4  ;;  %s347_s22 = int_to_ptr.vmem [resolvable:$true] %s346_s22 }
   0xd   :  { %380 = vmatpush3.msk.msra.mxu0 %vm33_vm2, %v448_v11  ;;  %393 = vmatpush3.msk.msra.mxu1 %vm33_vm2, %v448_v11  ;;  %s425_s23 = scalar_lea.vmem %s347_s22, 16  ;;  %s429_s24 = scalar_lea.vmem %s347_s22, 32 }
   0xe   :  { %381 = vmatprep.subr.msk.mxu0 %vm32_vm3, %v448_v11  ;;  %391 = vmatprep.subr.msk.mxu1 %vm32_vm3, %v448_v11  ;;  %p426_p0 = scmp.ne.s32.totalorder %s347_s22, %s425_s23  ;;  %p430_p1 = scmp.lt.s32.totalorder %s347_s22, %s347_s22 }
   0xf   :  { %382 = vmatpush3.msk.msra.mxu0 %vm32_vm3, %v448_v11  ;;  %394 = vmatpush3.msk.msra.mxu1 %vm32_vm3, %v448_v11  ;;  %p431_p2 = scmp.lt.s32.totalorder %s429_s24, %s425_s23 }
  0x10   :  { %384 = vmatmul.mubr.msk.f32.vlgmr.msra.gmra.mxu0 %vm69_vm0, %v42_v12  ;;  %387 = vmatmul.mubr.msk.f32.vlgmr.msra.gmra.mxu1 %vm69_vm0, %v44_v13 }
  0x11   :  { %56 = vperm.xlu0 %403, %v46_v14   ;;  %66 = vperm.xlu1 %404, %v48_v15   ;;  %p432_p3 = por %p431_p2, %p430_p1 }
  0x13   :  { %p433_p4 = pnand %p432_p3, %p426_p0 }
  0x15   :  { %290 = vperm.xlu0 %403, %v280_v16   ;;  %285 = vperm.xlu1 %404, %v279_v17  }
  0x19   :  { %295 = vperm.xlu1 %404, %v281_v18  }
  0x81   :  { %v52_v19 = vpop.permute.xlu0 %51  ;;  %v62_v20 = vpop.permute.xlu1 %61 }
  0x8c   :  { %v57_v21 = vpop.permute.xlu0 %56  ;;  %v67_v22 = vpop.permute.xlu1 %66 }
  0x90   :  { %v286_v49 = vpop.permute.xlu1 %285  ;;  %v291_v50 = vpop.permute.xlu0 %290 }
  0x94   :  { %v296_v51 = vpop.permute.xlu1 %295 }
  0xd0   :  { %v385_v23 = vpop.f32.mrf.mxu0  ;;  %v388_v24 = vpop.f32.mrf.mxu1 }
  0xd1   :  { %v154_v25 = vadd.f32 %v385_v23, %v57_v21  ;;  %v164_v26 = vadd.f32 %v388_v24, %v67_v22 }
  0xd2   :  { %v148_v29 = vpop.f32.mrf.mxu0  ;;  %v158_v32 = vpop.f32.mrf.mxu1 }
  0xd3   :  { %v366_v27 = vmul.f32 -1.442695, %v154_v25  ;;  %v368_v28 = vmul.f32 -1.442695, %v164_v26  ;;  %v149_v30 = vadd.f32 %v148_v29, %v52_v19  ;;  %v159_v33 = vadd.f32 %v158_v32, %v62_v20 }
  0xd5   :  { %405 = vpow2.f32 %v366_v27  ;;  %v365_v31 = vmul.f32 -1.442695, %v149_v30  ;;  %v367_v38 = vmul.f32 -1.442695, %v159_v33 }
  0xd6   :  { %407 = vpow2.f32 %v368_v28 }
  0xd7   :  { %409 = vpow2.f32 %v365_v31 }
  0xe2   :  { %v406_v34 = vpop.eup %405 }
  0xe3   :  { %v408_v35 = vpop.eup %407  ;;  %v180_v36 = vadd.f32 1.0, %v406_v34 }
  0xe4   :  { %v182_v37 = vadd.f32 1.0, %v408_v35  ;;  %v410_v39 = vpop.eup %409 }
  0xe5   :  { %411 = vrcp.f32 %v180_v36  ;;  %v179_v40 = vadd.f32 1.0, %v410_v39 }
  0xe6   :  { %413 = vrcp.f32 %v182_v37 }
  0xe7   :  { %415 = vpow2.f32 %v367_v38 }
  0xe8   :  { %417 = vrcp.f32 %v179_v40 }
  0xf2   :  { %v412_v41 = vpop.eup %411 }
  0xf3   :  { %213 = vrot.lane.b32.xlu0 %v412_v41, %s449_s15  ;;  %197 = vrot.lane.b32.xlu1 %v412_v41, %s450_s16  ;;  %v533_v42 = vpop.eup %413 }
  0xf4   :  { %v416_v43 = vpop.eup %415 }
  0xf5   :  { %v181_v44 = vadd.f32 1.0, %v416_v43  ;;  %v418_v45 = vpop.eup %417 }
  0xf7   :  { %229 = vrot.lane.b32.xlu0 %v412_v41, %s451_s17  ;;  %201 = vrot.lane.b32.xlu1 %v533_v42, %s450_s16  ;;  %419 = vrcp.f32 %v181_v44 }
  0xfb   :  { %245 = vrot.lane.b32.xlu0 %v412_v41, %s452_s18  ;;  %217 = vrot.lane.b32.xlu1 %v533_v42, %s449_s15 }
  0xff   :  { %261 = vrot.lane.b32.xlu0 %v412_v41, %s453_s19  ;;  %233 = vrot.lane.b32.xlu1 %v533_v42, %s451_s17 }
 0x103   :  { %249 = vrot.lane.b32.xlu0 %v533_v42, %s452_s18  ;;  %211 = vrot.lane.b32.xlu1 %v418_v45, %s449_s15 }
 0x104   :  { %v420_v46 = vpop.eup %419 }
 0x107   :  { %227 = vrot.lane.b32.xlu1 %v418_v45, %s451_s17  ;;  %195 = vrot.lane.b32.xlu0 %v418_v45, %s450_s16 }
 0x10b   :  { %243 = vrot.lane.b32.xlu1 %v418_v45, %s452_s18  ;;  %199 = vrot.lane.b32.xlu0 %v420_v46, %s450_s16 }
 0x10f   :  { %259 = vrot.lane.b32.xlu1 %v418_v45, %s453_s19  ;;  %215 = vrot.lane.b32.xlu0 %v420_v46, %s449_s15 }
 0x113   :  { %263 = vrot.lane.b32.xlu1 %v420_v46, %s453_s19  ;;  %231 = vrot.lane.b32.xlu0 %v420_v46, %s451_s17 }
 0x117   :  { %265 = vrot.lane.b32.xlu1 %v533_v42, %s453_s19  ;;  %247 = vrot.lane.b32.xlu0 %v420_v46, %s452_s18 }
 0x11b   :  { %300 = vperm.xlu0 %403, %v282_v47  }
 0x11f   :  { %324 = vperm.xlu0 %403, %v321_v48  }
 0x165   :  { %v214_v52 = vpop.permute.xlu0 %213  ;;  %v198_v53 = vpop.permute.xlu1 %197 }
 0x166   :  { %v208_v2 = vadd.f32 %v412_v41, %v198_v53 }
 0x168   :  { %v224_v7 = vadd.f32 %v214_v52, %v208_v2 }
 0x169   :  { %v230_v54 = vpop.permute.xlu0 %229  ;;  %v202_v55 = vpop.permute.xlu1 %201 }
 0x16a   :  { %v240_v12 = vadd.f32 %v230_v54, %v224_v7  ;;  %v210_v19 = vadd.f32 %v533_v42, %v202_v55 }
 0x16d   :  { %v246_v56 = vpop.permute.xlu0 %245  ;;  %v218_v57 = vpop.permute.xlu1 %217 }
 0x16e   :  { %v256_v15 = vadd.f32 %v246_v56, %v240_v12  ;;  %v226_v23 = vadd.f32 %v218_v57, %v210_v19 }
 0x171   :  { %v262_v58 = vpop.permute.xlu0 %261  ;;  %v234_v59 = vpop.permute.xlu1 %233 }
 0x172   :  { %v272_v20 = vadd.f32 %v262_v58, %v256_v15  ;;  %v242_v27 = vadd.f32 %v234_v59, %v226_v23 }
 0x174   :  { %v276_v26 = vmul.f32 0.16666667, %v272_v20 }
 0x175   :  { %v250_v60 = vpop.permute.xlu0 %249  ;;  %v212_v61 = vpop.permute.xlu1 %211 }
 0x176   :  { %v258_v30 = vadd.f32 %v250_v60, %v242_v27  ;;  %v304_v32 = vmul.f32 %v291_v50, %v276_v26 }
 0x178   :  { %v309_v36 = vsel %vm307_vm4, %v304_v32, 0.0 }
 0x179   :  { %v228_v62 = vpop.permute.xlu1 %227  ;;  %v196_v63 = vpop.permute.xlu0 %195 }
 0x17a   :  { %v207_v0 = vadd.f32 %v418_v45, %v196_v63 }
 0x17c   :  { %v223_v1 = vadd.f32 %v212_v61, %v207_v0 }
 0x17d   :  { %v244_v3 = vpop.permute.xlu1 %243  ;;  %v200_v4 = vpop.permute.xlu0 %199 }
 0x17e   :  { %v239_v6 = vadd.f32 %v228_v62, %v223_v1  ;;  %v209_v11 = vadd.f32 %v420_v46, %v200_v4 }
 0x180   :  { %v255_v10 = vadd.f32 %v244_v3, %v239_v6 }
 0x181   :  { %v216_v8 = vpop.permute.xlu0 %215  ;;  %v260_v9 = vpop.permute.xlu1 %259 }
 0x182   :  { %v225_v14 = vadd.f32 %v216_v8, %v209_v11  ;;  %v271_v16 = vadd.f32 %v260_v9, %v255_v10 }
 0x184   :  { %v275_v24 = vmul.f32 0.16666667, %v271_v16 }
 0x185   :  { %v232_v13 = vpop.permute.xlu0 %231  ;;  %v264_v17 = vpop.permute.xlu1 %263 }
 0x186   :  { %v241_v18 = vadd.f32 %v232_v13, %v225_v14  ;;  %v303_v31 = vmul.f32 %v286_v49, %v275_v24  ;;  %v329_v49 = vsub.s32 0, %v498_v5 }
 0x188   :  { %v308_v35 = vsel %vm307_vm4, %v303_v31, 0.0 }
 0x189   :  { %v248_v21 = vpop.permute.xlu0 %247  ;;  %v266_v28 = vpop.permute.xlu1 %265  ;;  %v310_v39 = vadd.f32 %v309_v36, %v308_v35 }
 0x18a   :  { %v257_v22 = vadd.f32 %v248_v21, %v241_v18  ;;  %v274_v33 = vadd.f32 %v266_v28, %v258_v30 }
 0x18c   :  { %v273_v25 = vadd.f32 %v264_v17, %v257_v22  ;;  %v278_v37 = vmul.f32 0.16666667, %v274_v33 }
 0x18e   :  { %v277_v29 = vmul.f32 0.16666667, %v273_v25 }
 0x190   :  { %v305_v34 = vmul.f32 %v296_v51, %v277_v29 }
 0x192   :  { %v311_v38 = vsel %vm307_vm4, %v305_v34, 0.0 }
 0x193   :  { %v312_v42 = vadd.f32 %v311_v38, %v310_v39 }
 0x196   :  { %v301_v40 = vpop.permute.xlu0 %300 }
 0x197   :  { %v306_v41 = vmul.f32 %v301_v40, %v278_v37 }
 0x199   :  { %v313_v43 = vsel %vm307_vm4, %v306_v41, 0.0 }
 0x19a   :  { %v314_v44 = vadd.f32 %v313_v43, %v312_v42  ;;  %v325_v50 = vpop.permute.xlu0 %324 }
 0x19b   :  { %v330_v53 = vrot.slane %v325_v50, %v329_v49 }
 0x19c   :  { %v315_v45 = vrot.slane %v314_v44, 4 }
 0x19e   :  { %v316_v46 = vadd.f32 %v315_v45, %v314_v44 }
 0x1a0   :  { %v317_v47 = vrot.slane %v316_v46, 2 }
 0x1a2   :  { %v318_v48 = vadd.f32 %v317_v47, %v316_v46 }
 0x1a4   :  { %v319_v52 = vrot.slane %v318_v48, 1 }
 0x1a6   :  { %v320_v51 = vadd.f32 %v319_v52, %v318_v48 }
 0x1a8   :  { %v331_v54 = vadd.f32 %v330_v53, %v320_v51 }
 0x1aa   :  { %v369_v55 = vmul.f32 -1.442695, %v331_v54 }
 0x1ac   :  { %421 = vpow2.f32 %v369_v55 }
 0x1b9   :  { %v422_v56 = vpop.eup %421 }
 0x1ba   :  { %v335_v57 = vadd.f32 1.0, %v422_v56 }
 0x1bc   :  { %423 = vrcp.f32 %v335_v57 }
 0x1c9   :  { %v424_v58 = vpop.eup %423 }
 0x1ca   :  { %339 = vst.msk [vmem:[#allocation3] sm:$0x1] %vm338_vm5, %v424_v58 }
 0x1cb   :  { %436 = shalt.err (!%p433_p4)
}
 0x1cc   :  { %349 = dma.vmem_to_hbm [thread:$0]  %s347_s22, 16, %s553_s5, [#allocation4]  }
 0x1cd   :  { %445 = dma.done.wait [#allocation4], 16  }
 0x1ce   :  { %446 = vsyncadd [#allocation4], 4294967280 }
 0x1cf   :  { %353 = vsyncpa [#allocation4], 1 }

</bundles_post_ra>
